<compile_context>
chip_gen: v7x
topology: tpu7x:2x2x1
jax: 0.10.0
libtpu: 0.0.40
codegen_flags: <defaults>
</compile_context>

<pallas_src>
import math

import jax
import jax.numpy as jnp
from jax import lax
from jax.experimental import pallas as pl
from jax.experimental.pallas import tpu as pltpu


def _pad_to(n, m):
    return -(-n // m) * m


# ----------------------------------------------------------------------------
# 1-D conv (taps w, zero padding k//2, stride 1) as a band matrix:
#   M[c, i, j] = w[c, i - j + pad]   (0 outside the tap range)
# conv along the last axis of an (H, W) map:  out = s @ M_c
# conv along the first axis:                  out = M_c^T @ s
# ----------------------------------------------------------------------------
def _band_matrix(w, n, k):
    pad = k // 2
    i = jnp.arange(n)[:, None]
    j = jnp.arange(n)[None, :]
    idx = i - j + pad                                     # (n, n)
    valid = (idx >= 0) & (idx < k)
    idx_c = jnp.clip(idx, 0, k - 1)
    return w[:, idx_c] * valid[None].astype(w.dtype)      # (2, n, n)


# ----------------------------------------------------------------------------
# Pallas kernel: one block of Bt batch rows per grid step.
#   x_ref : (Bt, C, HW) f32   lane-dense input block
#   m_ref : (2, HW, HW) bf16  folded conv operators ([0]=sum branch, [1]=max)
#   p_ref : (1,) f32 SMEM     fused scalar bias
#   o_ref : (Bt, HW) f32
# ----------------------------------------------------------------------------
def _msa_kernel(x_ref, m_ref, p_ref, o_ref):
    x = x_ref[...]                                        # (Bt, C, HW)
    s_sum = jnp.sum(x, axis=1).astype(jnp.bfloat16)       # channel sum (1/C folded)
    s_max = jnp.max(x, axis=1).astype(jnp.bfloat16)       # channel max
    z = (jnp.dot(s_sum, m_ref[0], preferred_element_type=jnp.float32)
         + jnp.dot(s_max, m_ref[1], preferred_element_type=jnp.float32)
         + p_ref[0])
    # sigmoid = 1 / (1 + exp(-z)); exp and reciprocal both go to the EUP slot.
    o_ref[...] = pl.reciprocal(1.0 + jnp.exp(-z), approx=True)


def _vmem_capacity_bytes():
    try:
        return int(pltpu.get_tpu_info().vmem_capacity_bytes)
    except Exception:
        return 128 << 20          # v5e/v6e default if query is unavailable


def _pick_bt(B, C, HW, io_budget, max_rows=1024):
    """Largest divisor of B whose (8,128)-padded in+out block fits io_budget.

    Output-block legality requires Bt % 8 == 0 or Bt == B (sublane rule);
    prefer >= 2 (ideally even) grid steps so both v7x TensorCores get work.
    """
    per_in = _pad_to(C, 8) * _pad_to(HW, 128) * 4         # padded f32 input row
    per_out = _pad_to(HW, 128) * 4                        # padded f32 output row
    cap = max(1, min(max_rows, io_budget // (per_in + per_out)))
    legal = [d for d in range(1, B + 1)
             if B % d == 0 and (d % 8 == 0 or d == B) and d <= cap]
    if not legal:
        legal = [d for d in range(1, B + 1) if B % d == 0 and d % 8 == 0] or [B]
    best = max(legal)
    for want_even in (True, False):
        for d in sorted(legal, reverse=True):
            steps = B // d
            if steps >= 2 and (steps % 2 == 0 or not want_even) and 2 * d >= best:
                return int(d)
    return int(best)


# ----------------------------------------------------------------------------
# Wrapper: fold parameters once per call (cheap XLA work), then launch.
# ----------------------------------------------------------------------------
def multibranch_spatial_attention(x, params):
    B, C, H, W = x.shape
    HW = H * W
    k = params["k"]

    # Band matrices of the four 1-D convs (untransposed).
    A1 = _band_matrix(params["w1_4d"].reshape(2, k), W, k)
    A2 = _band_matrix(params["w2_4d"].reshape(2, k - 2), W, k - 2)
    B3 = _band_matrix(params["w3_4d"].reshape(2, k), H, k)
    B4 = _band_matrix(params["w4_4d"].reshape(2, k - 2), H, k - 2)

    pw0, pw1 = params["pw_4d"].reshape(2)
    wt1 = params["wt1"][0]; wt2 = params["wt2"][0]
    wt3 = params["wt3"][0]; wt4 = params["wt4"][0]
    b1 = params["b1"][0]; b2 = params["b2"][0]
    b3 = params["b3"][0]; b4 = params["b4"][0]

    # Fold wt1..wt4, the pointwise-conv weights and 1/C (mean branch only) into
    # the per-axis operators, then kron-fold both axes into one (HW, HW)
    # operator per branch:  out_flat = s_flat @ (kron(I_H, A_c) + kron(B_c, I_W))
    chan_scale = jnp.array([1.0 / C, 1.0], jnp.float32)[:, None, None]
    A = (pw0 * (wt1 * A1 + wt2 * A2) * chan_scale).astype(jnp.float32)    # (2,W,W)
    Bm = (pw1 * (wt3 * B3 + wt4 * B4) * chan_scale).astype(jnp.float32)   # (2,H,H)
    eye_h = jnp.eye(H, dtype=jnp.float32)
    eye_w = jnp.eye(W, dtype=jnp.float32)
    M = jnp.stack([jnp.kron(eye_h, A[c]) + jnp.kron(Bm[c], eye_w)
                   for c in range(2)]).astype(jnp.bfloat16)               # (2,HW,HW)
    bias = (pw0 * (wt1 * b1 + wt2 * b2)
            + pw1 * (wt3 * b3 + wt4 * b4)
            + params["pw_b"][0]).reshape(1).astype(jnp.float32)           # (1,)

    # ---- padding- and generation-aware block sizing -------------------------
    vmem_cap = _vmem_capacity_bytes()
    m_bytes = 2 * _pad_to(HW, 16) * _pad_to(HW, 128) * 2          # bf16, padded
    # v7x has 64 MiB VMEM per TC -> keep double-buffered in+out well under it;
    # v5e/v6e have 128 MiB -> use big blocks (mem-bound sweet spot).
    base_budget = (18 << 20) if vmem_cap <= (80 << 20) else (40 << 20)
    io_budget = max(base_budget - 2 * m_bytes, 4 << 20)
    Bt = _pick_bt(B, C, HW, io_budget)
    grid = (B // Bt,)

    in_blk = Bt * _pad_to(C, 8) * _pad_to(HW, 128) * 4            # padded layout
    out_blk = _pad_to(Bt, 8) * _pad_to(HW, 128) * 4
    need = 2 * (in_blk + out_blk + m_bytes) + (2 << 20)
    vmem_limit = int(min(max(need, 32 << 20), max(vmem_cap - (16 << 20), 32 << 20)))

    cost = pl.CostEstimate(
        flops=int(B * (4 * HW * HW + 2 * C * HW)),
        transcendentals=int(B * HW),
        bytes_accessed=int(B * C * HW * 4 + B * HW * 4 + 2 * HW * HW * 2),
    )

    x_flat = x.reshape(B, C, HW)          # contiguous NCHW reshape: free
    out = pl.pallas_call(
        _msa_kernel,
        out_shape=jax.ShapeDtypeStruct((B, HW), jnp.float32),
        grid=grid,
        in_specs=[
            pl.BlockSpec((Bt, C, HW), lambda b: (b, 0, 0)),
            pl.BlockSpec((2, HW, HW), lambda b: (0, 0, 0)),   # constant block index
            pl.BlockSpec(memory_space=pltpu.MemorySpace.SMEM),
        ],
        out_specs=pl.BlockSpec((Bt, HW), lambda b: (b, 0)),
        compiler_params=pltpu.CompilerParams(
            dimension_semantics=("parallel",),
            vmem_limit_bytes=vmem_limit,
        ),
        cost_estimate=cost,
    )(x_flat, M, bias)
    return out.reshape(B, 1, H, W)


# ----------------------------------------------------------------------------
# Deterministic parameter init (shapes from the module's __init__)
# ----------------------------------------------------------------------------
def init_params(HW, key, gamma=1.2, b=1):
    t = int(abs((math.log(HW, 2) + b) / gamma))
    k = t if t % 2 else t + 1
    keys = jax.random.split(key, 10)

    def u(kk, shape):
        return jax.random.uniform(kk, shape, jnp.float32, -0.3, 0.3)

    return {
        "k": k,
        "w1_4d": u(keys[0], (1, 2, 1, k)),      "b1": u(keys[1], (1,)),
        "w2_4d": u(keys[2], (1, 2, 1, k - 2)),  "b2": u(keys[3], (1,)),
        "w3_4d": u(keys[4], (1, 2, k, 1)),      "b3": u(keys[5], (1,)),
        "w4_4d": u(keys[6], (1, 2, k - 2, 1)),  "b4": u(keys[7], (1,)),
        "pw_4d": u(keys[8], (1, 2, 1, 1)),      "pw_b": u(keys[9], (1,)),
        "wt1": jnp.ones((1,), jnp.float32),     # nn.Parameter(torch.ones(1))
        "wt2": jnp.ones((1,), jnp.float32),
        "wt3": jnp.ones((1,), jnp.float32),
        "wt4": jnp.ones((1,), jnp.float32),
    }


# ----------------------------------------------------------------------------
# Pure-JAX reference (independent path via lax.conv_general_dilated)
# ----------------------------------------------------------------------------
def ref_forward(x, p):
    avg = jnp.mean(x, axis=1, keepdims=True)
    mx = jnp.max(x, axis=1, keepdims=True)
    s = jnp.concatenate([avg, mx], axis=1)

    def conv(inp, w, bias, pad):
        out = lax.conv_general_dilated(
            inp, w, (1, 1), ((pad[0], pad[0]), (pad[1], pad[1])),
            dimension_numbers=("NCHW", "OIHW", "NCHW"),
            precision=lax.Precision.HIGHEST)
        return out + bias.reshape(1, -1, 1, 1)

    k = p["k"]
    c1 = conv(s, p["w1_4d"], p["b1"], (0, k // 2))
    c2 = conv(s, p["w2_4d"], p["b2"], (0, (k - 2) // 2))
    c3 = conv(s, p["w3_4d"], p["b3"], (k // 2, 0))
    c4 = conv(s, p["w4_4d"], p["b4"], ((k - 2) // 2, 0))
    x1 = c1 * p["wt1"] + c2 * p["wt2"]
    x2 = c3 * p["wt3"] + c4 * p["wt4"]
    cat = jnp.concatenate([x1, x2], axis=1)
    pw = conv(cat, p["pw_4d"], p["pw_b"], (0, 0))
    return jax.nn.sigmoid(pw)


if __name__ == "__main__":
    B, C, H, W = 2, 4, 16, 16
    key = jax.random.PRNGKey(0)
    kx, kp = jax.random.split(key)

    x = jax.random.normal(kx, (B, C, H, W), jnp.float32)
    params = init_params(H, kp)            # HW = spatial size (16) -> k = 5

    out = multibranch_spatial_attention(x, params)
    out = jax.block_until_ready(out)

    ref = ref_forward(x, params)
    assert out.shape == (B, 1, H, W)
    err = float(jnp.max(jnp.abs(out - ref)))
    # bf16 MXU operands vs the HIGHEST-precision f32 reference: post-sigmoid
    # error stays well under 5e-3 at these magnitudes.
    assert jnp.allclose(out, ref, rtol=5e-3, atol=5e-3), f"max abs err = {err}"

    print("KERNEL_OK")
</pallas_src>

<mosaic_0001>
module attributes {stable_mosaic.version = 11 : i64} {
  func.func @_msa_kernel(%arg0: i32, %arg1: memref<2x4x256xf32, #tpu.memory_space<vmem>>, %arg2: memref<2x256x256xbf16, #tpu.memory_space<vmem>>, %arg3: memref<1xf32, #tpu.memory_space<smem>>, %arg4: memref<2x256xf32, #tpu.memory_space<vmem>>) attributes {dimension_semantics = [#tpu.dimension_semantics<parallel>], iteration_bounds = array<i64: 1>, scalar_prefetch = 0 : i64, scratch_operands = 0 : i64, tpu.core_type = #tpu.core_type<tc>, window_params = [{transform_indices = @transform_0, window_bounds = array<i64: 2, 4, 256>}, {pipeline_mode = #tpu.pipeline_mode<synchronous>, transform_indices = @transform_1, window_bounds = array<i64: 2, 256, 256>}, {transform_indices = @transform_2, window_bounds = array<i64: 1>}, {transform_indices = @transform_3, window_bounds = array<i64: 2, 256>}]} {
    %c0 = arith.constant 0 : index
    %c0_0 = arith.constant 0 : index
    %c0_1 = arith.constant 0 : index
    %0 = vector.load %arg1[%c0, %c0_0, %c0_1] : memref<2x4x256xf32, #tpu.memory_space<vmem>>, vector<2x4x256xf32>
    %cst = arith.constant dense<0.000000e+00> : vector<2x256xf32>
    %1 = vector.multi_reduction <add>, %0, %cst [1] : vector<2x4x256xf32> to vector<2x256xf32>
    %2 = arith.truncf %1 : vector<2x256xf32> to vector<2x256xbf16>
    %cst_2 = arith.constant dense<0xFF800000> : vector<2x256xf32>
    %3 = vector.multi_reduction <maximumf>, %0, %cst_2 [1] : vector<2x4x256xf32> to vector<2x256xf32>
    %4 = arith.truncf %3 : vector<2x256xf32> to vector<2x256xbf16>
    %c0_3 = arith.constant 0 : index
    %c0_4 = arith.constant 0 : index
    %c0_5 = arith.constant 0 : index
    %5 = vector.load %arg2[%c0_3, %c0_4, %c0_5] : memref<2x256x256xbf16, #tpu.memory_space<vmem>>, vector<1x256x256xbf16>
    %6 = vector.shape_cast %5 : vector<1x256x256xbf16> to vector<256x256xbf16>
    %cst_6 = arith.constant dense<0.000000e+00> : vector<2x256xf32>
    %7 = tpu.matmul %2, %6, %cst_6 {dimension_numbers = #tpu.dot_dimension_numbers<[1], [0], [0], [1], [0, 0, 1, 1], [], []>} : vector<2x256xbf16>, vector<256x256xbf16>, vector<2x256xf32> -> vector<2x256xf32>
    %c1 = arith.constant 1 : index
    %c0_7 = arith.constant 0 : index
    %c0_8 = arith.constant 0 : index
    %8 = vector.load %arg2[%c1, %c0_7, %c0_8] : memref<2x256x256xbf16, #tpu.memory_space<vmem>>, vector<1x256x256xbf16>
    %9 = vector.shape_cast %8 : vector<1x256x256xbf16> to vector<256x256xbf16>
    %cst_9 = arith.constant dense<0.000000e+00> : vector<2x256xf32>
    %10 = tpu.matmul %4, %9, %cst_9 {dimension_numbers = #tpu.dot_dimension_numbers<[1], [0], [0], [1], [0, 0, 1, 1], [], []>} : vector<2x256xbf16>, vector<256x256xbf16>, vector<2x256xf32> -> vector<2x256xf32>
    %11 = arith.addf %7, %10 : vector<2x256xf32>
    %c0_10 = arith.constant 0 : index
    %12 = memref.load %arg3[%c0_10] : memref<1xf32, #tpu.memory_space<smem>>
    %13 = vector.broadcast %12 : f32 to vector<2x256xf32>
    %14 = arith.addf %11, %13 : vector<2x256xf32>
    %cst_11 = arith.constant 0.000000e+00 : f32
    %15 = vector.broadcast %cst_11 : f32 to vector<2x256xf32>
    %16 = arith.subf %15, %14 : vector<2x256xf32>
    %17 = math.exp %16 : vector<2x256xf32>
    %cst_12 = arith.constant 1.000000e+00 : f32
    %18 = vector.broadcast %cst_12 : f32 to vector<2x256xf32>
    %19 = arith.addf %18, %17 : vector<2x256xf32>
    %20 = tpu.reciprocal %19 {approx = true} : vector<2x256xf32> -> vector<2x256xf32>
    %c0_13 = arith.constant 0 : index
    %c0_14 = arith.constant 0 : index
    %21 = vector.load %arg4[%c0_13, %c0_14] : memref<2x256xf32, #tpu.memory_space<vmem>>, vector<2x256xf32>
    tpu.vector_store %arg4[%c0_13, %c0_14], %20 {strides = array<i32>} : memref<2x256xf32, #tpu.memory_space<vmem>>, vector<2x256xf32>,
    return
  }
  func.func @transform_0(%arg0: i32) -> (i32, i32, i32) {
    %c0_i32 = arith.constant 0 : i32
    %c0_i32_0 = arith.constant 0 : i32
    %c0_i32_1 = arith.constant 0 : i32
    return %arg0, %c0_i32, %c0_i32_0 : i32, i32, i32
  }
  func.func @transform_1(%arg0: i32) -> (i32, i32, i32) {
    %c0_i32 = arith.constant 0 : i32
    %c0_i32_0 = arith.constant 0 : i32
    %c0_i32_1 = arith.constant 0 : i32
    %c0_i32_2 = arith.constant 0 : i32
    return %c0_i32, %c0_i32_0, %c0_i32_1 : i32, i32, i32
  }
  func.func @transform_2(%arg0: i32) -> i32 {
    %c0_i32 = arith.constant 0 : i32
    %c0_i32_0 = arith.constant 0 : i32
    return %c0_i32 : i32
  }
  func.func @transform_3(%arg0: i32) -> (i32, i32) {
    %c0_i32 = arith.constant 0 : i32
    %c0_i32_0 = arith.constant 0 : i32
    return %arg0, %c0_i32 : i32, i32
  }
}

</mosaic_0001>

<bundles_post_ra>
// kernel: tpu_custom_call.1
= control target key start
LH: loop header
LB: loop body
LE: loop exit
PB: predicated region body
PF: predicated region fallthrough
CT: control target
= control target key end

     0   :  { %9 = vsyncpa [#allocation4], 0  ;;  %s979_s0 = inlined_call_operand.hbm [shape: f32[2,4,256], index: 0, kind: input, shape index: {}]   ;;  %s980_s1 = inlined_call_operand.hbm [shape: bf16[2,256,256], index: 1, kind: input, shape index: {}]   ;;  %s981_s2 = inlined_call_operand.<no memory space> [shape: f32[1], index: 2, kind: input, shape index: {}]   ;;  %s982_s3 = inlined_call_operand.hbm [shape: f32[2,256], index: 3, kind: output, shape index: {}]  }
   0x1   :  { %10 = vsyncpa [#allocation7], 0 }
   0x2   :  { %11 = vsyncpa [#allocation5], 0  ;;  %s903_s12 = smov [#allocation3]   ;;  %s831_s16 = scalar_lea.hbm %s979_s0, 256 }
   0x3   :  { %s17_s13 = sshll.u32 %s903_s12, 4  ;;  %p832_p0 = scmp.ne.s32.totalorder %s979_s0, %s831_s16  ;;  %s18_s13 = int_to_ptr.vmem [resolvable:$true] %s17_s13 }
   0x4   :  { %p835_p1 = scmp.lt.u32.totalorder %s831_s16, %s979_s0 }
   0x6   :  { %p837_p2 = pnand %p835_p1, %p832_p0 }
   0x8   :  { %840 = shalt.err (!%p837_p2)
}
   0x9   :  { %s841_s21 = scalar_lea.vmem %s18_s13, 256  ;;  %p846_p4 = scmp.lt.s32.totalorder %s18_s13, %s18_s13 }
   0xa   :  { %p842_p3 = scmp.ne.s32.totalorder %s18_s13, %s841_s21  ;;  %p847_p5 = scmp.lt.s32.totalorder %s841_s21, %s841_s21 }
   0xc   :  { %p848_p6 = por %p847_p5, %p846_p4 }
   0xe   :  { %p849_p7 = pnand %p848_p6, %p842_p3 }
  0x10   :  { %852 = shalt.err (!%p849_p7)
}
  0x11   :  { %s904_s22 = smov 128   ;;  %s905_s23 = smov 8  }
  0x12   :  { %23 = dma.hbm_to_vmem [thread:$0]  %s979_s0, 256, %s18_s13, [#allocation4], %s904_s22, %s904_s22, %s905_s23  }
  0x13   :  { %s906_s26 = smov [#allocation6]   ;;  %s853_s30 = scalar_lea.hbm %s980_s1, 8192 }
  0x14   :  { %s29_s27 = sshll.u32 %s906_s26, 4  ;;  %p854_p8 = scmp.ne.s32.totalorder %s980_s1, %s853_s30  ;;  %s30_s27 = int_to_ptr.vmem [resolvable:$true] %s29_s27 }
  0x15   :  { %p857_p9 = scmp.lt.u32.totalorder %s853_s30, %s980_s1 }
  0x17   :  { %p859_p10 = pnand %p857_p9, %p854_p8 }
  0x19   :  { %862 = shalt.err (!%p859_p10)
}
  0x1a   :  { %s863_s8 = scalar_lea.vmem %s30_s27, 8192  ;;  %p868_p12 = scmp.lt.s32.totalorder %s30_s27, %s30_s27 }
  0x1b   :  { %p864_p11 = scmp.ne.s32.totalorder %s30_s27, %s863_s8  ;;  %p869_p13 = scmp.lt.s32.totalorder %s863_s8, %s863_s8 }
  0x1d   :  { %p870_p0 = por %p869_p13, %p868_p12 }
  0x1f   :  { %p871_p1 = pnand %p870_p0, %p864_p11 }
  0x21   :  { %874 = shalt.err (!%p871_p1)
}
  0x22   :  { %35 = dma.hbm_to_vmem [thread:$0]  %s980_s1, 8192, %s30_s27, [#allocation7], %s904_s22, %s904_s22, %s905_s23  }
  0x23   :  { %897 = dma.done.wait [#allocation4], 256  }
  0x24   :  { %898 = vsyncadd [#allocation4], 4294967040 }
  0x25   :  { %899 = dma.done.wait [#allocation7], 8192  }
  0x26   :  { %900 = vsyncadd [#allocation7], 4294959104  ;;  %v725_v0 = vld [vmem:[#allocation6 + $0x104] ss:$8 sps:$4 sm:$0xff]   ;;  %v729_v2 = vld [vmem:[#allocation6 + $0x100] ss:$8 sps:$4 sm:$0xff]  }
  0x27   :  { %v727_v1 = vld [vmem:[#allocation6 + $0x4] ss:$8 sps:$4 sm:$0xff]   ;;  %357 = vmatprep.subr.bf16.mxu0 %v725_v0  ;;  %v730_v3 = vld [vmem:[#allocation6] ss:$8 sps:$4 sm:$0xff]   ;;  %v731_v4 = vld [vmem:[#allocation6 + $0x114] ss:$8 sps:$4 sm:$0xff]  }
  0x28   :  { %572 = vmatprep.subr.bf16.mxu1 %v727_v1  ;;  %358 = vmatpush1.bf16.msra.mxu0 %v729_v2  ;;  %v733_v5 = vld [vmem:[#allocation6 + $0x14] ss:$8 sps:$4 sm:$0xff]   ;;  %v735_v6 = vld [vmem:[#allocation6 + $0x110] ss:$8 sps:$4 sm:$0xff]   ;;  %v737_v8 = vld [vmem:[#allocation6 + $0x124] ss:$8 sps:$4 sm:$0xff]  }
  0x29   :  { %573 = vmatpush1.bf16.msra.mxu1 %v730_v3  ;;  %359 = vmatprep.subr.bf16.mxu0 %v731_v4  ;;  %v736_v7 = vld [vmem:[#allocation6 + $0x10] ss:$8 sps:$4 sm:$0xff]   ;;  %v739_v9 = vld [vmem:[#allocation6 + $0x24] ss:$8 sps:$4 sm:$0xff]   ;;  %v741_v10 = vld [vmem:[#allocation6 + $0x120] ss:$8 sps:$4 sm:$0xff]  }
  0x2a   :  { %574 = vmatprep.subr.bf16.mxu1 %v733_v5  ;;  %v742_v11 = vld [vmem:[#allocation6 + $0x20] ss:$8 sps:$4 sm:$0xff]   ;;  %v743_v12 = vld [vmem:[#allocation6 + $0x134] ss:$8 sps:$4 sm:$0xff]   ;;  %v747_v14 = vld [vmem:[#allocation6 + $0x130] ss:$8 sps:$4 sm:$0xff]  }
  0x2b   :  { %v745_v13 = vld [vmem:[#allocation6 + $0x34] ss:$8 sps:$4 sm:$0xff]   ;;  %v748_v15 = vld [vmem:[#allocation6 + $0x30] ss:$8 sps:$4 sm:$0xff]   ;;  %v749_v16 = vld [vmem:[#allocation6 + $0x144] ss:$8 sps:$4 sm:$0xff]  }
  0x2c   :  { %360 = vmatpush1.bf16.msra.mxu0 %v735_v6  ;;  %v751_v17 = vld [vmem:[#allocation6 + $0x44] ss:$8 sps:$4 sm:$0xff]   ;;  %v753_v18 = vld [vmem:[#allocation6 + $0x140] ss:$8 sps:$4 sm:$0xff]   ;;  %v755_v20 = vld [vmem:[#allocation6 + $0x154] ss:$8 sps:$4 sm:$0xff]  }
  0x2d   :  { %575 = vmatpush1.bf16.msra.mxu1 %v736_v7  ;;  %361 = vmatprep.subr.bf16.mxu0 %v737_v8  ;;  %v754_v19 = vld [vmem:[#allocation6 + $0x40] ss:$8 sps:$4 sm:$0xff]   ;;  %v757_v21 = vld [vmem:[#allocation6 + $0x54] ss:$8 sps:$4 sm:$0xff]   ;;  %v759_v22 = vld [vmem:[#allocation6 + $0x150] ss:$8 sps:$4 sm:$0xff]  }
  0x2e   :  { %576 = vmatprep.subr.bf16.mxu1 %v739_v9  ;;  %v760_v23 = vld [vmem:[#allocation6 + $0x50] ss:$8 sps:$4 sm:$0xff]   ;;  %v761_v24 = vld [vmem:[#allocation6 + $0x164] ss:$8 sps:$4 sm:$0xff]   ;;  %v765_v26 = vld [vmem:[#allocation6 + $0x160] ss:$8 sps:$4 sm:$0xff]  }
  0x2f   :  { %v763_v25 = vld [vmem:[#allocation6 + $0x64] ss:$8 sps:$4 sm:$0xff]   ;;  %v766_v27 = vld [vmem:[#allocation6 + $0x60] ss:$8 sps:$4 sm:$0xff]   ;;  %v767_v28 = vld [vmem:[#allocation6 + $0x174] ss:$8 sps:$4 sm:$0xff]  }
  0x30   :  { %362 = vmatpush1.bf16.msra.mxu0 %v741_v10  ;;  %v769_v29 = vld [vmem:[#allocation6 + $0x74] ss:$8 sps:$4 sm:$0xff]   ;;  %v771_v30 = vld [vmem:[#allocation6 + $0x170] ss:$8 sps:$4 sm:$0xff]   ;;  %v773_v32 = vld [vmem:[#allocation6 + $0x184] ss:$8 sps:$4 sm:$0xff]  }
  0x31   :  { %577 = vmatpush1.bf16.msra.mxu1 %v742_v11  ;;  %363 = vmatprep.subr.bf16.mxu0 %v743_v12  ;;  %v772_v31 = vld [vmem:[#allocation6 + $0x70] ss:$8 sps:$4 sm:$0xff]   ;;  %v775_v33 = vld [vmem:[#allocation6 + $0x84] ss:$8 sps:$4 sm:$0xff]   ;;  %v777_v34 = vld [vmem:[#allocation6 + $0x180] ss:$8 sps:$4 sm:$0xff]  }
  0x32   :  { %578 = vmatprep.subr.bf16.mxu1 %v745_v13  ;;  %v778_v35 = vld [vmem:[#allocation6 + $0x80] ss:$8 sps:$4 sm:$0xff]   ;;  %v779_v36 = vld [vmem:[#allocation6 + $0x194] ss:$8 sps:$4 sm:$0xff]   ;;  %v783_v38 = vld [vmem:[#allocation6 + $0x190] ss:$8 sps:$4 sm:$0xff]  }
  0x33   :  { %v781_v37 = vld [vmem:[#allocation6 + $0x94] ss:$8 sps:$4 sm:$0xff]   ;;  %v784_v39 = vld [vmem:[#allocation6 + $0x90] ss:$8 sps:$4 sm:$0xff]   ;;  %v785_v40 = vld [vmem:[#allocation6 + $0x1a4] ss:$8 sps:$4 sm:$0xff]  }
  0x34   :  { %364 = vmatpush1.bf16.msra.mxu0 %v747_v14  ;;  %v787_v41 = vld [vmem:[#allocation6 + $0xa4] ss:$8 sps:$4 sm:$0xff]   ;;  %v789_v42 = vld [vmem:[#allocation6 + $0x1a0] ss:$8 sps:$4 sm:$0xff]   ;;  %v791_v44 = vld [vmem:[#allocation6 + $0x1b4] ss:$8 sps:$4 sm:$0xff]  }
  0x35   :  { %579 = vmatpush1.bf16.msra.mxu1 %v748_v15  ;;  %365 = vmatprep.subr.bf16.mxu0 %v749_v16  ;;  %v790_v43 = vld [vmem:[#allocation6 + $0xa0] ss:$8 sps:$4 sm:$0xff]   ;;  %vm52_vm0 = vcmask 1043456   ;;  %v793_v45 = vld [vmem:[#allocation6 + $0xb4] ss:$8 sps:$4 sm:$0xff]   ;;  %vm190_vm1 = vcmask 1041409  }
  0x36   :  { %580 = vmatprep.subr.bf16.mxu1 %v751_v17  ;;  %v795_v46 = vld [vmem:[#allocation6 + $0x1b0] ss:$8 sps:$4 sm:$0xff]   ;;  %v797_v53 = vld [vmem:[#allocation6 + $0x1c4] ss:$8 sps:$4 sm:$0xff]   ;;  %v801_v7 = vld [vmem:[#allocation6 + $0x1c0] ss:$8 sps:$4 sm:$0xff]  }
  0x37   :  { %v44_v47 = vld [vmem:[#allocation3] sm:$0xff]  ;;  %v45_v49 = vld [vmem:[#allocation3 + $0x8] sm:$0xff]  ;;  %v799_v58 = vld [vmem:[#allocation6 + $0xc4] ss:$8 sps:$4 sm:$0xff]  }
  0x38   :  { %366 = vmatpush1.bf16.msra.mxu0 %v753_v18  ;;  %v796_v48 = vld [vmem:[#allocation6 + $0xb0] ss:$8 sps:$4 sm:$0xff]   ;;  %v48_v50 = vcombine.high %v44_v47, %v44_v47  ;;  %v85_v51 = vsel %vm52_vm0, %v44_v47, -inf  ;;  %v53_v52 = vsel %vm52_vm0, %v44_v47, 0.0  ;;  %v49_v54 = vcombine.high %v45_v49, %v45_v49  ;;  %v802_v8 = vld [vmem:[#allocation6 + $0xc0] ss:$8 sps:$4 sm:$0xff]  }
  0x39   :  { %581 = vmatpush1.bf16.msra.mxu1 %v754_v19  ;;  %367 = vmatprep.subr.bf16.mxu0 %v755_v20  ;;  %v86_v55 = vrot.slane %v85_v51, 4  ;;  %v99_v56 = vsel %vm52_vm0, %v45_v49, -inf  ;;  %v54_v57 = vrot.slane %v53_v52, 4  ;;  %v67_v62 = vsel %vm52_vm0, %v45_v49, 0.0  ;;  %v803_v13 = vld [vmem:[#allocation6 + $0x1d4] ss:$8 sps:$4 sm:$0xff]  }
  0x3a   :  { %582 = vmatprep.subr.bf16.mxu1 %v757_v21  ;;  %v92_v59 = vsel %vm52_vm0, %v48_v50, -inf  ;;  %v60_v60 = vsel %vm52_vm0, %v48_v50, 0.0  ;;  %v100_v61 = vrot.slane %v99_v56, 4  ;;  %v106_v0 = vsel %vm52_vm0, %v49_v54, -inf  ;;  %v805_v14 = vld [vmem:[#allocation6 + $0xd4] ss:$8 sps:$4 sm:$0xff]  }
  0x3b   :  { %v93_v63 = vrot.slane %v92_v59, 4  ;;  %v61_v1 = vrot.slane %v60_v60, 4  ;;  %v74_v2 = vsel %vm52_vm0, %v49_v54, 0.0  ;;  %v107_v3 = vrot.slane %v106_v0, 4  ;;  %v813_v47 = vld [vmem:[#allocation6 + $0x1e0] ss:$8 sps:$4 sm:$0xff]  }
  0x3c   :  { %368 = vmatpush1.bf16.msra.mxu0 %v759_v22  ;;  %v75_v4 = vrot.slane %v74_v2, 4  ;;  %v87_v5 = vmax.f32 %v85_v51, %v86_v55  ;;  %v101_v6 = vmax.f32 %v99_v56, %v100_v61  ;;  %v55_v11 = vadd.f32 %v54_v57, %v53_v52  ;;  %v817_v54 = vld [vmem:[#allocation6 + $0xf4] ss:$8 sps:$4 sm:$0xff]  }
  0x3d   :  { %583 = vmatpush1.bf16.msra.mxu1 %v760_v23  ;;  %369 = vmatprep.subr.bf16.mxu0 %v761_v24  ;;  %v94_v9 = vmax.f32 %v92_v59, %v93_v63  ;;  %v62_v10 = vadd.f32 %v61_v1, %v60_v60  ;;  %v68_v12 = vrot.slane %v67_v62, 4  ;;  %v108_v15 = vmax.f32 %v106_v0, %v107_v3  ;;  %v820_v3 = vld [vmem:[#allocation6 + $0xf0] ss:$8 sps:$4 sm:$0xff]  }
  0x3e   :  { %584 = vmatprep.subr.bf16.mxu1 %v763_v25  ;;  %v76_v16 = vadd.f32 %v75_v4, %v74_v2  ;;  %v88_v17 = vrot.slane %v87_v5, 2  ;;  %v102_v18 = vrot.slane %v101_v6, 2  ;;  %v56_v21 = vrot.slane %v55_v11, 2  ;;  %v819_v2 = vld [vmem:[#allocation6 + $0x1f0] ss:$8 sps:$4 sm:$0xff]  }
  0x3f   :  { %v95_v19 = vrot.slane %v94_v9, 2  ;;  %v63_v20 = vrot.slane %v62_v10, 2  ;;  %v69_v22 = vadd.f32 %v68_v12, %v67_v62  ;;  %v109_v23 = vrot.slane %v108_v15, 2 }
  0x40   :  { %370 = vmatpush1.bf16.msra.mxu0 %v765_v26  ;;  %v77_v24 = vrot.slane %v76_v16, 2  ;;  %v89_v25 = vmax.f32 %v87_v5, %v88_v17  ;;  %v103_v26 = vmax.f32 %v101_v6, %v102_v18 }
  0x41   :  { %585 = vmatpush1.bf16.msra.mxu1 %v766_v27  ;;  %371 = vmatprep.subr.bf16.mxu0 %v767_v28  ;;  %v807_v27 = vld [vmem:[#allocation6 + $0x1d0] ss:$8 sps:$4 sm:$0xff]  }
  0x42   :  { %586 = vmatprep.subr.bf16.mxu1 %v769_v29  ;;  %v808_v28 = vld [vmem:[#allocation6 + $0xd0] ss:$8 sps:$4 sm:$0xff]   ;;  %v96_v29 = vmax.f32 %v94_v9, %v95_v19 }
  0x44   :  { %372 = vmatpush1.bf16.msra.mxu0 %v771_v30  ;;  %v64_v30 = vadd.f32 %v63_v20, %v62_v10 }
  0x45   :  { %587 = vmatpush1.bf16.msra.mxu1 %v772_v31  ;;  %373 = vmatprep.subr.bf16.mxu0 %v773_v32  ;;  %v57_v31 = vadd.f32 %v56_v21, %v55_v11  ;;  %v70_v32 = vrot.slane %v69_v22, 2 }
  0x46   :  { %588 = vmatprep.subr.bf16.mxu1 %v775_v33  ;;  %v809_v33 = vld [vmem:[#allocation6 + $0x1e4] ss:$8 sps:$4 sm:$0xff]  }
  0x48   :  { %374 = vmatpush1.bf16.msra.mxu0 %v777_v34  ;;  %v811_v34 = vld [vmem:[#allocation6 + $0xe4] ss:$8 sps:$4 sm:$0xff]  }
  0x49   :  { %589 = vmatpush1.bf16.msra.mxu1 %v778_v35  ;;  %375 = vmatprep.subr.bf16.mxu0 %v779_v36  ;;  %v110_v35 = vmax.f32 %v108_v15, %v109_v23  ;;  %v78_v36 = vadd.f32 %v77_v24, %v76_v16 }
  0x4a   :  { %590 = vmatprep.subr.bf16.mxu1 %v781_v37  ;;  %v90_v37 = vrot.slane %v89_v25, 1 }
  0x4c   :  { %376 = vmatpush1.bf16.msra.mxu0 %v783_v38  ;;  %v104_v38 = vrot.slane %v103_v26, 1 }
  0x4d   :  { %591 = vmatpush1.bf16.msra.mxu1 %v784_v39  ;;  %377 = vmatprep.subr.bf16.mxu0 %v785_v40  ;;  %v97_v39 = vrot.slane %v96_v29, 1  ;;  %v65_v40 = vrot.slane %v64_v30, 1 }
  0x4e   :  { %592 = vmatprep.subr.bf16.mxu1 %v787_v41  ;;  %v58_v41 = vrot.slane %v57_v31, 1 }
  0x4f   :  { %v98_v49 = vmax.f32 %v96_v29, %v97_v39  ;;  %v66_v50 = vadd.f32 %v65_v40, %v64_v30 }
  0x50   :  { %378 = vmatpush1.bf16.msra.mxu0 %v789_v42  ;;  %v71_v42 = vadd.f32 %v70_v32, %v69_v22  ;;  %v59_v51 = vadd.f32 %v58_v41, %v57_v31  ;;  %v614_v22 = vstv %s981_s2  ;;  %s907_s2 = smov [#allocation8]  }
  0x51   :  { %593 = vmatpush1.bf16.msra.mxu1 %v790_v43  ;;  %379 = vmatprep.subr.bf16.mxu0 %v791_v44  ;;  %v111_v43 = vrot.slane %v110_v35, 1  ;;  %v79_v44 = vrot.slane %v78_v36, 1  ;;  %v82_v59 = vpack.c.bf16 %v66_v50, %v66_v50  ;;  %s645_s11 = sshll.u32 %s907_s2, 4  ;;  %s646_s11 = int_to_ptr.vmem [resolvable:$true] %s645_s11 }
  0x52   :  { %594 = vmatprep.subr.bf16.mxu1 %v793_v45  ;;  %v91_v45 = vmax.f32 %v89_v25, %v90_v37  ;;  %v72_v52 = vrot.slane %v71_v42, 1  ;;  %v81_v1 = vpack.c.bf16 %v59_v51, %v59_v51  ;;  %s875_s12 = scalar_lea.vmem %s646_s11, 64  ;;  %p880_p3 = scmp.lt.s32.totalorder %s646_s11, %s646_s11 }
  0x53   :  { %v112_v55 = vmax.f32 %v110_v35, %v111_v43  ;;  %v80_v56 = vadd.f32 %v79_v44, %v78_v36  ;;  %v403_v5 = vunpack.c.l.b16 %v82_v59  ;;  %p876_p2 = scmp.ne.s32.totalorder %s646_s11, %s875_s12  ;;  %p881_p4 = scmp.lt.s32.totalorder %s875_s12, %s875_s12 }
  0x54   :  { %380 = vmatpush1.bf16.msra.mxu0 %v795_v46  ;;  %v105_v46 = vmax.f32 %v103_v26, %v104_v38  ;;  %v113_v57 = vpack.c.bf16 %v91_v45, %v91_v45  ;;  %v73_v61 = vadd.f32 %v72_v52, %v71_v42  ;;  %v402_v10 = vunpack.c.l.b16 %v81_v1 }
  0x55   :  { %595 = vmatpush1.bf16.msra.mxu1 %v796_v48  ;;  %381 = vmatprep.subr.bf16.mxu0 %v797_v53  ;;  %v814_v48 = vld [vmem:[#allocation6 + $0xe0] ss:$8 sps:$4 sm:$0xff]   ;;  %v815_v53 = vld [vmem:[#allocation6 + $0x1f4] ss:$8 sps:$4 sm:$0xff]   ;;  %v116_v62 = vpack.c.bf16 %v112_v55, %v112_v55  ;;  %v84_v63 = vpack.c.bf16 %v80_v56, %v80_v56  ;;  %p882_p5 = por %p881_p4, %p880_p3 }
  0x56   :  { %596 = vmatprep.subr.bf16.mxu1 %v799_v58  ;;  %v114_v58 = vpack.c.bf16 %v98_v49, %v98_v49  ;;  %v115_v60 = vpack.c.bf16 %v105_v46, %v105_v46  ;;  %v186_v0 = vunpack.c.l.b16 %v113_v57 }
  0x57   :  { %v405_v9 = vunpack.c.l.b16 %v84_v63  ;;  %p883_p6 = pnand %p882_p5, %p876_p2 }
  0x58   :  { %382 = vmatpush1.bf16.msra.mxu0 %v801_v7  ;;  %v187_v4 = vunpack.c.l.b16 %v114_v58  ;;  %v188_v6 = vunpack.c.l.b16 %v115_v60  ;;  %v83_v7 = vpack.c.bf16 %v73_v61, %v73_v61 }
  0x59   :  { %597 = vmatpush1.bf16.msra.mxu1 %v802_v8  ;;  %383 = vmatprep.subr.bf16.mxu0 %v803_v13  ;;  %v189_v8 = vunpack.c.l.b16 %v116_v62 }
  0x5a   :  { %598 = vmatprep.subr.bf16.mxu1 %v805_v14  ;;  %v191_v11 = vsel %vm190_vm1, %v188_v6, %v186_v0  ;;  %v404_v12 = vunpack.c.l.b16 %v83_v7  ;;  %v407_v14 = vsel %vm190_vm1, %v405_v9, %v403_v5 }
  0x5b   :  { %v192_v13 = vsel %vm190_vm1, %v189_v8, %v187_v4  ;;  %v193_v15 = vpack.c.b16 %v191_v11, %v191_v11  ;;  %v409_v17 = vpack.c.b16 %v407_v14, %v407_v14 }
  0x5c   :  { %384 = vmatpush1.bf16.msra.mxu0 %v807_v27  ;;  %v194_v16 = vpack.c.b16 %v192_v13, %v192_v13  ;;  %v406_v18 = vsel %vm190_vm1, %v404_v12, %v402_v10 }
  0x5d   :  { %599 = vmatpush1.bf16.msra.mxu1 %v808_v28  ;;  %385 = vmatprep.subr.bf16.mxu0 %v809_v33  ;;  %v408_v19 = vpack.c.b16 %v406_v18, %v406_v18 }
  0x5e   :  { %600 = vmatprep.subr.bf16.mxu1 %v811_v34  ;;  %389 = vmatprep.mubr.bf16.mxu0 %v194_v16 }
  0x5f   :  { %604 = vmatprep.mubr.bf16.mxu1 %v409_v17 }
  0x60   :  { %386 = vmatpush1.bf16.msra.mxu0 %v813_v47 }
  0x61   :  { %601 = vmatpush1.bf16.msra.mxu1 %v814_v48  ;;  %387 = vmatprep.subr.bf16.mxu0 %v815_v53 }
  0x62   :  { %602 = vmatprep.subr.bf16.mxu1 %v817_v54 }
  0x64   :  { %388 = vmatpush1.bf16.msra.mxu0 %v819_v2 }
  0x65   :  { %603 = vmatpush1.bf16.msra.mxu1 %v820_v3 }
  0x67   :  { %390 = vmatmul.mubr.bf16.vlgmr.msra.gmra.mrb[0].mxu0 %v193_v15 }
  0x68   :  { %605 = vmatmul.mubr.bf16.vlgmr.msra.gmra.mrb[0].mxu1 %v408_v19 }
 0x13a   :  { %v391_v20 = vpop.f32.mrb[0].mxu0 }
 0x13b   :  { %v606_v21 = vpop.f32.mrb[0].mxu1  ;;  %v393_v24 = vpop.f32.mrb[1].mxu0 }
 0x13c   :  { %v607_v23 = vadd.f32 %v606_v21, %v391_v20  ;;  %v608_v25 = vpop.f32.mrb[1].mxu1  ;;  %v395_v27 = vpop.f32.mrb[2].mxu0 }
 0x13d   :  { %v609_v26 = vadd.f32 %v608_v25, %v393_v24  ;;  %v610_v28 = vpop.f32.mrb[2].mxu1  ;;  %v396_v30 = vpop.f32.mrb[3].mxu0 }
 0x13e   :  { %v615_v29 = vadd.f32 %v614_v22, %v607_v23  ;;  %v611_v31 = vpop.f32.mrb[3].mxu1 }
 0x13f   :  { %v616_v32 = vadd.f32 %v614_v22, %v609_v26 }
 0x140   :  { %v617_v33 = vsub.f32 0.0, %v615_v29 }
 0x141   :  { %v618_v34 = vsub.f32 0.0, %v616_v32 }
 0x142   :  { %v619_v35 = vmul.f32 1.442695, %v617_v33 }
 0x143   :  { %v621_v36 = vmul.f32 1.442695, %v618_v34 }
 0x144   :  { %823 = vpow2.f32 %v619_v35 }
 0x145   :  { %825 = vpow2.f32 %v621_v36 }
 0x14e   :  { %v824_v37 = vpop.eup %823 }
 0x14f   :  { %v826_v38 = vpop.eup %825  ;;  %v623_v39 = vadd.f32 1.0, %v824_v37 }
 0x150   :  { %v624_v40 = vadd.f32 1.0, %v826_v38 }
 0x151   :  { %827 = vrcp.f32 %v623_v39 }
 0x152   :  { %829 = vrcp.f32 %v624_v40 }
 0x15b   :  { %v828_v41 = vpop.eup %827 }
 0x15c   :  { %v830_v42 = vpop.eup %829 }
 0x15d   :  { %v629_v43 = vcombine.low %v828_v41, %v830_v42 }
 0x15f   :  { %719 = vst.sshfl [vmem:[#allocation8] sm:$0x33 pattern:$0x76325410] %v629_v43 }
 0x160   :  { %886 = shalt.err (!%p883_p6)
}
 0x161   :  { %s887_s15 = scalar_lea.hbm %s982_s3, 64 }
 0x162   :  { %p888_p7 = scmp.ne.s32.totalorder %s982_s3, %s887_s15  ;;  %p891_p8 = scmp.lt.u32.totalorder %s887_s15, %s982_s3 }
 0x164   :  { %p893_p9 = pnand %p891_p8, %p888_p7 }
 0x166   :  { %896 = shalt.err (!%p893_p9)
}
 0x167   :  { %648 = dma.vmem_to_hbm [thread:$0]  %s646_s11, 64, %s982_s3, [#allocation5]  }
 0x168   :  { %901 = dma.done.wait [#allocation5], 64  }
 0x169   :  { %902 = vsyncadd [#allocation5], 4294967232 }
 0x16a   :  { %652 = vsyncpa [#allocation4], 1 }
 0x16b   :  { %653 = vsyncpa [#allocation7], 1 }
 0x16c   :  { %654 = vsyncpa [#allocation5], 1 }

</bundles_post_ra>
